<compile_context>
chip_gen: v7x
topology: tpu7x:2x2x1
jax: 0.10.0
libtpu: 0.0.40
codegen_flags: <defaults>
</compile_context>

<pallas_src>
import functools

import jax
import jax.numpy as jnp
from jax.experimental import pallas as pl
from jax.experimental.pallas import tpu as pltpu


def _focal_kernel(x_ref, t_ref, sum_ref, cnt_ref, *,
                  alpha, gamma, ignore_idx, n_pixels, tn):
    # x_ref: (1, C, TN) logits (native dtype), t_ref: (1, 1, TN) int32 labels.
    x = x_ref[0].astype(jnp.float32)          # (C, TN)  pixels on lanes
    t = t_ref[0]                              # (1, TN)
    C, TN = x.shape

    valid = (t != ignore_idx)                 # (1, TN) bool

    # Tail masking only when the pixel axis is not a multiple of TN
    # (avoids jnp.pad in HBM; padded lanes of the boundary block are garbage).
    if n_pixels % tn != 0:
        j = pl.program_id(1)
        col = j * tn + jax.lax.broadcasted_iota(jnp.int32, (1, TN), 1)
        in_range = col < n_pixels
        valid = jnp.logical_and(valid, in_range)
        x = jnp.where(in_range, x, 0.0)       # keep garbage (possible NaNs) inert

    # log-sum-exp over the (small) class / sublane axis.
    m = jnp.max(x, axis=0, keepdims=True)     # (1, TN)
    e = jnp.exp(x - m)                        # (C, TN)
    s = jnp.sum(e, axis=0, keepdims=True)     # (1, TN)
    lse = m + jnp.log(s)                      # (1, TN)

    # Gather the target-class logit via a sublane-iota one-hot select.
    ci = jax.lax.broadcasted_iota(jnp.int32, (C, TN), 0)
    x_t = jnp.sum(jnp.where(ci == t, x, 0.0), axis=0, keepdims=True)  # (1, TN)

    p_t = jnp.exp(x_t - lse)                  # softmax prob of the target class
    log2_pt = jnp.log2(p_t + 1e-12)           # matches torch.log2(p + 1e-12)
    q = 1.0 - p_t
    if gamma == 2.0:
        pow_term = q * q                      # VPU mul instead of EUP pow
    elif gamma == 1.0:
        pow_term = q
    elif gamma == 0.0:
        pow_term = jnp.ones_like(q)
    else:
        pow_term = q ** gamma

    validf = valid.astype(jnp.float32)
    fl = (-alpha) * pow_term * log2_pt * validf   # (1, TN)

    # Per-block partial reduction (no serial scalar accumulator across the grid).
    sum_ref[...] = jnp.sum(fl).reshape(1, 1, 1, 1)
    cnt_ref[...] = jnp.sum(validf).reshape(1, 1, 1, 1)


def focal_loss(inputs, targets, *, alpha=0.25, gamma=2.0, ignore_idx=-1, tn=2048):
    """inputs: (B, C, H, W) float logits (NCHW, PyTorch layout).
       targets: (B, H, W) int labels; ignore_idx marks ignored pixels."""
    B, C, H, W = inputs.shape
    hw = H * W
    x = inputs.reshape(B, C, hw)                       # free view, no transpose/cast
    t = targets.reshape(B, 1, hw).astype(jnp.int32)

    if hw <= tn:
        tn = hw                                        # full-extent lane block (always legal)
    gj = pl.cdiv(hw, tn)

    kernel = functools.partial(
        _focal_kernel, alpha=float(alpha), gamma=float(gamma),
        ignore_idx=int(ignore_idx), n_pixels=hw, tn=tn)

    sums, cnts = pl.pallas_call(
        kernel,
        out_shape=(jax.ShapeDtypeStruct((B, gj, 1, 1), jnp.float32),
                   jax.ShapeDtypeStruct((B, gj, 1, 1), jnp.float32)),
        grid_spec=pltpu.PrefetchScalarGridSpec(
            num_scalar_prefetch=0,
            grid=(B, gj),
            in_specs=[
                pl.BlockSpec((1, C, tn), lambda b, j: (b, 0, j)),
                pl.BlockSpec((1, 1, tn), lambda b, j: (b, 0, j)),
            ],
            out_specs=(
                pl.BlockSpec((1, 1, 1, 1), lambda b, j: (b, j, 0, 0)),
                pl.BlockSpec((1, 1, 1, 1), lambda b, j: (b, j, 0, 0)),
            ),
        ),
        compiler_params=pltpu.CompilerParams(
            dimension_semantics=("parallel", "parallel")),
    )(x, t)

    total = jnp.sum(sums)
    count = jnp.sum(cnts)
    # Guard the all-ignored case (PyTorch would give NaN via 0/0).
    return total / jnp.maximum(count, 1.0)


def focal_loss_ref(inputs, targets, *, alpha=0.25, gamma=2.0, ignore_idx=-1):
    """Pure-JAX reference mirroring the PyTorch module."""
    B, C, H, W = inputs.shape
    p = jax.nn.softmax(
        jnp.transpose(inputs, (0, 2, 3, 1)).astype(jnp.float32), axis=-1
    ).reshape(-1, C)
    t = targets.reshape(-1)
    valid = (t != ignore_idx)
    one_hot = jax.nn.one_hot(jnp.where(valid, t, 0), C, dtype=jnp.float32)
    fl = jnp.sum(-alpha * (1.0 - p) ** gamma * one_hot * jnp.log2(p + 1e-12), axis=-1)
    fl = jnp.where(valid, fl, 0.0)
    return jnp.sum(fl) / jnp.sum(valid.astype(jnp.float32))


if __name__ == "__main__":
    key = jax.random.PRNGKey(0)
    k_x, k_t, k_m = jax.random.split(key, 3)

    # Primary test: B=2, C=4, H=W=16 (HW=256 -> single full-extent lane block).
    B, C, H, W = 2, 4, 16, 16
    inputs = jax.random.normal(k_x, (B, C, H, W), dtype=jnp.float32)
    targets = jax.random.randint(k_t, (B, H, W), 0, C, dtype=jnp.int32)
    drop = jax.random.uniform(k_m, (B, H, W)) < 0.1
    targets = jnp.where(drop, -1, targets)

    out = focal_loss(inputs, targets, alpha=0.25, gamma=2.0, ignore_idx=-1)
    out = jax.block_until_ready(out)
    ref = focal_loss_ref(inputs, targets, alpha=0.25, gamma=2.0, ignore_idx=-1)
    assert jnp.allclose(out, ref, rtol=2e-4, atol=1e-5), (out, ref)

    # Secondary test: non-multiple pixel count (HW=289, TN=128) to exercise the
    # in-kernel tail mask (no HBM padding pass).
    B2, C2, H2, W2 = 2, 4, 17, 17
    k_x2, k_t2 = jax.random.split(k_x)
    inputs2 = jax.random.normal(k_x2, (B2, C2, H2, W2), dtype=jnp.float32)
    targets2 = jax.random.randint(k_t2, (B2, H2, W2), 0, C2, dtype=jnp.int32)
    out2 = focal_loss(inputs2, targets2, alpha=0.25, gamma=2.0, ignore_idx=-1, tn=128)
    out2 = jax.block_until_ready(out2)
    ref2 = focal_loss_ref(inputs2, targets2, alpha=0.25, gamma=2.0, ignore_idx=-1)
    assert jnp.allclose(out2, ref2, rtol=2e-4, atol=1e-5), (out2, ref2)

    print("KERNEL_OK")
</pallas_src>

<mosaic_0001>
module attributes {stable_mosaic.version = 11 : i64} {
  func.func @_focal_kernel(%arg0: i32, %arg1: i32, %arg2: memref<1x4x256xf32, #tpu.memory_space<vmem>>, %arg3: memref<1x1x256xi32, #tpu.memory_space<vmem>>, %arg4: memref<1x1x1x1xf32, #tpu.memory_space<vmem>>, %arg5: memref<1x1x1x1xf32, #tpu.memory_space<vmem>>) attributes {dimension_semantics = [#tpu.dimension_semantics<parallel>, #tpu.dimension_semantics<parallel>], iteration_bounds = array<i64: 2, 1>, scalar_prefetch = 0 : i64, scratch_operands = 0 : i64, tpu.core_type = #tpu.core_type<tc>, window_params = [{transform_indices = @transform_0, window_bounds = array<i64: 1, 4, 256>}, {transform_indices = @transform_1, window_bounds = array<i64: 1, 1, 256>}, {transform_indices = @transform_2, window_bounds = array<i64: 1, 1, 1, 1>}, {transform_indices = @transform_3, window_bounds = array<i64: 1, 1, 1, 1>}]} {
    %c0 = arith.constant 0 : index
    %c0_0 = arith.constant 0 : index
    %c0_1 = arith.constant 0 : index
    %0 = vector.load %arg2[%c0, %c0_0, %c0_1] : memref<1x4x256xf32, #tpu.memory_space<vmem>>, vector<1x4x256xf32>
    %1 = vector.shape_cast %0 : vector<1x4x256xf32> to vector<4x256xf32>
    %c0_2 = arith.constant 0 : index
    %c0_3 = arith.constant 0 : index
    %c0_4 = arith.constant 0 : index
    %2 = vector.load %arg3[%c0_2, %c0_3, %c0_4] : memref<1x1x256xi32, #tpu.memory_space<vmem>>, vector<1x1x256xi32>
    %3 = vector.shape_cast %2 : vector<1x1x256xi32> to vector<1x256xi32>
    %c-1_i32 = arith.constant -1 : i32
    %4 = vector.broadcast %c-1_i32 : i32 to vector<1x256xi32>
    %5 = arith.cmpi ne, %3, %4 : vector<1x256xi32>
    %cst = arith.constant dense<0xFF800000> : vector<256xf32>
    %6 = vector.multi_reduction <maximumf>, %1, %cst [0] : vector<4x256xf32> to vector<256xf32>
    %7 = vector.shape_cast %6 : vector<256xf32> to vector<1x256xf32>
    %8 = vector.broadcast %7 : vector<1x256xf32> to vector<4x256xf32>
    %9 = arith.subf %1, %8 : vector<4x256xf32>
    %10 = math.exp %9 : vector<4x256xf32>
    %cst_5 = arith.constant dense<0.000000e+00> : vector<256xf32>
    %11 = vector.multi_reduction <add>, %10, %cst_5 [0] : vector<4x256xf32> to vector<256xf32>
    %12 = vector.shape_cast %11 : vector<256xf32> to vector<1x256xf32>
    %13 = math.log %12 : vector<1x256xf32>
    %14 = arith.addf %7, %13 : vector<1x256xf32>
    %15 = tpu.iota {dimensions = array<i32: 0>} : vector<4x256xi32>
    %16 = vector.broadcast %3 : vector<1x256xi32> to vector<4x256xi32>
    %17 = arith.cmpi eq, %15, %16 : vector<4x256xi32>
    %cst_6 = arith.constant 0.000000e+00 : f32
    %18 = vector.broadcast %cst_6 : f32 to vector<4x256xf32>
    %19 = arith.select %17, %1, %18 : vector<4x256xi1>, vector<4x256xf32>
    %cst_7 = arith.constant dense<0.000000e+00> : vector<256xf32>
    %20 = vector.multi_reduction <add>, %19, %cst_7 [0] : vector<4x256xf32> to vector<256xf32>
    %21 = vector.shape_cast %20 : vector<256xf32> to vector<1x256xf32>
    %22 = arith.subf %21, %14 : vector<1x256xf32>
    %23 = math.exp %22 : vector<1x256xf32>
    %cst_8 = arith.constant 9.99999996E-13 : f32
    %24 = vector.broadcast %cst_8 : f32 to vector<1x256xf32>
    %25 = arith.addf %23, %24 : vector<1x256xf32>
    %26 = math.log %25 : vector<1x256xf32>
    %cst_9 = arith.constant 2.000000e+00 : f32
    %27 = math.log %cst_9 : f32
    %28 = vector.broadcast %27 : f32 to vector<1x256xf32>
    %29 = arith.divf %26, %28 : vector<1x256xf32>
    %cst_10 = arith.constant 1.000000e+00 : f32
    %30 = vector.broadcast %cst_10 : f32 to vector<1x256xf32>
    %31 = arith.subf %30, %23 : vector<1x256xf32>
    %32 = arith.mulf %31, %31 : vector<1x256xf32>
    %33 = arith.extui %5 : vector<1x256xi1> to vector<1x256xi32>
    %34 = arith.sitofp %33 : vector<1x256xi32> to vector<1x256xf32>
    %cst_11 = arith.constant -2.500000e-01 : f32
    %35 = vector.broadcast %cst_11 : f32 to vector<1x256xf32>
    %36 = arith.mulf %35, %32 : vector<1x256xf32>
    %37 = arith.mulf %36, %29 : vector<1x256xf32>
    %38 = arith.mulf %37, %34 : vector<1x256xf32>
    %39 = vector.shape_cast %38 : vector<1x256xf32> to vector<1x1x256xf32>
    %cst_12 = arith.constant dense<0.000000e+00> : vector<1xf32>
    %40 = vector.multi_reduction <add>, %39, %cst_12 [1, 2] : vector<1x1x256xf32> to vector<1xf32>
    %41 = vector.shape_cast %40 : vector<1xf32> to vector<1x1x1xf32>
    %42 = vector.extract %41[0, 0, 0] : f32 from vector<1x1x1xf32>
    %43 = vector.broadcast %42 : f32 to vector<1x1x1x1xf32>
    %c0_13 = arith.constant 0 : index
    %c0_14 = arith.constant 0 : index
    %c0_15 = arith.constant 0 : index
    %c0_16 = arith.constant 0 : index
    %44 = vector.load %arg4[%c0_13, %c0_14, %c0_15, %c0_16] : memref<1x1x1x1xf32, #tpu.memory_space<vmem>>, vector<1x1x1x1xf32>
    tpu.vector_store %arg4[%c0_13, %c0_14, %c0_15, %c0_16], %43 {strides = array<i32>} : memref<1x1x1x1xf32, #tpu.memory_space<vmem>>, vector<1x1x1x1xf32>,
    %45 = vector.shape_cast %34 : vector<1x256xf32> to vector<1x1x256xf32>
    %cst_17 = arith.constant dense<0.000000e+00> : vector<1xf32>
    %46 = vector.multi_reduction <add>, %45, %cst_17 [1, 2] : vector<1x1x256xf32> to vector<1xf32>
    %47 = vector.shape_cast %46 : vector<1xf32> to vector<1x1x1xf32>
    %48 = vector.extract %47[0, 0, 0] : f32 from vector<1x1x1xf32>
    %49 = vector.broadcast %48 : f32 to vector<1x1x1x1xf32>
    %c0_18 = arith.constant 0 : index
    %c0_19 = arith.constant 0 : index
    %c0_20 = arith.constant 0 : index
    %c0_21 = arith.constant 0 : index
    %50 = vector.load %arg5[%c0_18, %c0_19, %c0_20, %c0_21] : memref<1x1x1x1xf32, #tpu.memory_space<vmem>>, vector<1x1x1x1xf32>
    tpu.vector_store %arg5[%c0_18, %c0_19, %c0_20, %c0_21], %49 {strides = array<i32>} : memref<1x1x1x1xf32, #tpu.memory_space<vmem>>, vector<1x1x1x1xf32>,
    return
  }
  func.func @transform_0(%arg0: i32, %arg1: i32) -> (i32, i32, i32) {
    %c0_i32 = arith.constant 0 : i32
    %c0_i32_0 = arith.constant 0 : i32
    return %arg0, %c0_i32, %arg1 : i32, i32, i32
  }
  func.func @transform_1(%arg0: i32, %arg1: i32) -> (i32, i32, i32) {
    %c0_i32 = arith.constant 0 : i32
    %c0_i32_0 = arith.constant 0 : i32
    return %arg0, %c0_i32, %arg1 : i32, i32, i32
  }
  func.func @transform_2(%arg0: i32, %arg1: i32) -> (i32, i32, i32, i32) {
    %c0_i32 = arith.constant 0 : i32
    %c0_i32_0 = arith.constant 0 : i32
    %c0_i32_1 = arith.constant 0 : i32
    return %arg0, %arg1, %c0_i32, %c0_i32_0 : i32, i32, i32, i32
  }
  func.func @transform_3(%arg0: i32, %arg1: i32) -> (i32, i32, i32, i32) {
    %c0_i32 = arith.constant 0 : i32
    %c0_i32_0 = arith.constant 0 : i32
    %c0_i32_1 = arith.constant 0 : i32
    return %arg0, %arg1, %c0_i32, %c0_i32_0 : i32, i32, i32, i32
  }
}

</mosaic_0001>

<bundles_post_ra>
// kernel: tpu_custom_call.1
= control target key start
LH: loop header
LB: loop body
LE: loop exit
PB: predicated region body
PF: predicated region fallthrough
CT: control target
= control target key end

     0   :  { %9 = vsyncpa [#allocation3], 0  ;;  %s989_s0 = inlined_call_operand.hbm [shape: f32[2,4,256], index: 0, kind: input, shape index: {}]   ;;  %s990_s1 = inlined_call_operand.hbm [shape: s32[2,1,256], index: 1, kind: input, shape index: {}]   ;;  %s991_s2 = inlined_call_operand.vmem [shape: f32[2,1,1,1], index: 2, kind: output, shape index: {0}]   ;;  %s992_s3 = inlined_call_operand.vmem [shape: f32[2,1,1,1], index: 3, kind: output, shape index: {1}]  }
   0x1   :  { %11 = vsyncpa [#allocation3 + $0x1], 0 }
   0x2   :  { %12 = vsyncpa [#allocation5], 0 }
   0x3   :  { %14 = vsyncpa [#allocation5 + $0x1], 0  ;;  %s795_s12 = smov 0   ;;  %s797_s13 = smov 0  }
   0x4   :  { %s799_s14 = smov 0   ;;  %s801_s15 = smov 0  }
   0x5   :  { %s803_s16 = smov 0   ;;  %s805_s17 = smov 0  }
   0x6 LB: > { %s558_s18 = sadd.s32 4294967295, %s770_s17   ;;  %s32_s19 = sadd.s32 1, %s766_s16  ;;  %s770_s17 = sphi %s805_s17, %s20_s17   ;;  %s766_s16 = sphi %s803_s16, %s1006_s16   ;;  %s762_s15 = sphi %s801_s15, %s1005_s15   ;;  %s758_s14 = sphi %s799_s14, %s1004_s14   ;;  %s754_s13 = sphi %s797_s13, %s1003_s13   ;;  %s750_s12 = sphi %s795_s12, %s1002_s12  }
   0x7   : > { %p34_p0 = scmp.ge.s32.totalorder %s32_s19, 2  ;;  %s41_s20 = sadd.s32 1, %s758_s14 }
   0x8   : > { %p48_p1 = scmp.ne.s32.totalorder %s758_s14, %s754_s13  ;;  %p49_p2 = scmp.eq.s32.totalorder %s770_s17, 0 }
   0x9   : > { %s1008_s19 = smov (%p34_p0, %s32_s19), 0  ;;  %p54_p4 = scmp.ne.s32.totalorder %s754_s13, %s750_s12 }
   0xa   : > { %p831_p3 = por %p49_p2, %p48_p1  ;;  %s36_s22 = ssub.s32 %s766_s16, %s1008_s19 }
   0xb   : > { %p55_p5 = scmp.eq.s32.totalorder %s558_s18, 0  ;;  %p39_p6 = scmp.eq.s32.totalorder %s36_s22, 0 }
   0xc   : > { %p591_p8 = scmp.lt.s32.totalorder %s770_s17, 2  ;;  %s847_s25 = sand.u32 1, %s758_s14  }
   0xd   : > { %p838_p7 = por %p55_p5, %p54_p4  ;;  %s574_s26 = sshll.u32 %s766_s16, 7 }
   0xe   : > { %s844_s24 = scalar_select %p39_p6, %s758_s14, %s41_s20  }
   0xf   : > { %s995_s23 = scalar_select %p838_p7, 1, 0 }
  0x10   : > { %s562_s27 = sshll.u32 %s847_s25, 3  ;;  %s854_s30 = scalar_lea.hbm %s989_s0, %s574_s26 }
  0x11   : > { %s166_s4 = scalar_lea.vmem [#allocation2], %s562_s27  ;;  %p858_p9 = pnand %p591_p8, %p831_p3 }
  0x12   : > { %s176_s5 = sshll.u32 %s166_s4, 4  ;;  %s163_s7 = scalar_lea.sflag [#allocation3], %s847_s25  ;;  %s862_s5 = int_to_ptr.vmem [resolvable:$true] %s176_s5 }
  0x13   : > { %s656_s8 = scalar_lea.hbm %s854_s30, 128  ;;  %p658_p13 = pneg %p858_p9 }
  0x14   : > { %p657_p12 = scmp.ne.s32.totalorder %s854_s30, %s656_s8  ;;  %s661_s11 = scalar_lea.hbm %s989_s0, 256 }
  0x15   : > { %p662_p2 = scmp.lt.u32.totalorder %s854_s30, %s989_s0  ;;  %p663_p3 = scmp.lt.u32.totalorder %s661_s11, %s656_s8 }
  0x16   : > { %p659_p0 = pnand %p658_p13, %p657_p12  ;;  %p665_p5 = scmp.lt.u32.totalorder %s656_s8, %s854_s30 }
  0x17   : > { %p664_p4 = por %p663_p3, %p662_p2 }
  0x18   : > { %p660_p1 = pneg %p659_p0 }
  0x19   : > { %p666_p6 = por %p665_p5, %p664_p4 }
  0x1b   : > { %p667_p8 = pnand %p666_p6, %p660_p1 }
  0x1d   : > { %670 = shalt.err (!%p667_p8)
}
  0x1e   : > { %s671_s20 = scalar_lea.vmem %s862_s5, 128  ;;  %s772_s21 = smov [#allocation2]  }
  0x1f   : > { %p672_p12 = scmp.ne.s32.totalorder %s862_s5, %s671_s20  ;;  %s676_s22 = sshll.u32 %s772_s21, 4  ;;  %s677_s22 = int_to_ptr.vmem [resolvable:$false] %s676_s22 }
  0x20   : > { %s678_s26 = scalar_lea.vmem %s677_s22, 256  ;;  %p679_p11 = scmp.lt.s32.totalorder %s862_s5, %s677_s22 }
  0x21   : > { %p674_p0 = pnand %p672_p12, %p658_p13  ;;  %p680_p2 = scmp.lt.s32.totalorder %s678_s26, %s671_s20 }
  0x23   : > { %p675_p10 = pneg %p674_p0  ;;  %p681_p3 = por %p680_p2, %p679_p11 }
  0x25   : > { %p682_p4 = pnand %p681_p3, %p675_p10 }
  0x27   : > { %685 = shalt.err (!%p682_p4)
}
  0x28   : > { %587 = dma.hbm_to_vmem [thread:$0]  (!%p858_p9), %s854_s30, 128, %s862_s5, %s163_s7  }
  0x29   : > { %p997_p1 = scmp.lt.s32.totalorder %s770_s17, 3  ;;  %p998_p5 = scmp.ge.s32.totalorder %s770_s17, 1 }
  0x2a   : > { %s565_s28 = sshll.u32 %s847_s25, 1  ;;  %s575_s29 = sshll.u32 %s766_s16, 5 }
  0x2b   : > { %p896_p6 = pnand %p998_p5, %p997_p1  ;;  %s905_s9 = scalar_lea.hbm %s990_s1, %s575_s29 }
  0x2c   : > { %s187_s10 = scalar_lea.vmem [#allocation4], %s565_s28  ;;  %s184_s30 = scalar_lea.sflag [#allocation5], %s847_s25 }
  0x2d   : > { %s999_s27 = scalar_select %p896_p6, 1, 0 }
  0x2e   : > { %s197_s11 = sshll.u32 %s187_s10, 4  ;;  %s686_s5 = scalar_lea.hbm %s905_s9, 32  ;;  %s198_s11 = int_to_ptr.vmem [resolvable:$true] %s197_s11 }
  0x2f   : > { %p687_p10 = scmp.ne.s32.totalorder %s905_s9, %s686_s5  ;;  %s691_s18 = scalar_lea.hbm %s990_s1, 64 }
  0x30   : > { %p692_p12 = scmp.lt.u32.totalorder %s905_s9, %s990_s1  ;;  %p693_p0 = scmp.lt.u32.totalorder %s691_s18, %s686_s5 }
  0x31   : > { %p689_p11 = pnand %p687_p10, %p658_p13  ;;  %p695_p3 = scmp.lt.u32.totalorder %s686_s5, %s905_s9 }
  0x32   : > { %p694_p2 = por %p693_p0, %p692_p12 }
  0x33   : > { %p690_p8 = pneg %p689_p11 }
  0x34   : > { %p696_p4 = por %p695_p3, %p694_p2 }
  0x36   : > { %p697_p1 = pnand %p696_p4, %p690_p8 }
  0x38   : > { %700 = shalt.err (!%p697_p1)
}
  0x39   : > { %s701_s25 = scalar_lea.vmem %s198_s11, 32  ;;  %s773_s22 = smov [#allocation4]  }
  0x3a   : > { %p702_p5 = scmp.ne.s32.totalorder %s198_s11, %s701_s25  ;;  %s706_s26 = sshll.u32 %s773_s22, 4  ;;  %s707_s26 = int_to_ptr.vmem [resolvable:$false] %s706_s26 }
  0x3b   : > { %s708_s28 = scalar_lea.vmem %s707_s26, 64  ;;  %p709_p7 = scmp.lt.s32.totalorder %s198_s11, %s707_s26 }
  0x3c   : > { %p704_p10 = pnand %p702_p5, %p658_p13  ;;  %p710_p6 = scmp.lt.s32.totalorder %s708_s28, %s701_s25 }
  0x3e   : > { %p705_p11 = pneg %p704_p10  ;;  %p711_p0 = por %p710_p6, %p709_p7 }
  0x40   : > { %p712_p12 = pnand %p711_p0, %p705_p11 }
  0x42   : > { %715 = shalt.err (!%p712_p12)
}
  0x43   : > { %590 = dma.hbm_to_vmem [thread:$0]  (!%p858_p9), %s905_s9, 32, %s198_s11, %s184_s30  }
  0x44   : > { %p1000_p8 = scmp.ne.s32.totalorder %s999_s27, 0 }
  0x45   : > { %s208_s29 = sand.u32 (!%p1000_p8), 1, %s754_s13   ;;  %p1001_p13 = scmp.ne.s32.totalorder (!%p1000_p8), %s995_s23, 0 }
  0x46   : > { %206 = sbr.rel (%p1000_p8) target bundleno = 393 (0x189), region = 28  ;;  %s569_s4 = sshll.u32 (!%p1000_p8), %s208_s29, 3 }
  0x47   : > { %s209_s8 = scalar_lea.sflag (!%p1000_p8), [#allocation3], %s208_s29  ;;  %s212_s10 = scalar_lea.vmem (!%p1000_p8), [#allocation2], %s569_s4 }
  0x4d   : > { %741 = dma.done.wait (%p1001_p13), %s209_s8, 128  }
  0x4e   : > { %743 = vsyncadd (%p1001_p13), %s209_s8, 4294967168  ;;  %s570_s5 = sshll.u32 %s208_s29, 1  ;;  %s218_s7 = scalar_lea.sflag [#allocation5], %s208_s29 }
  0x4f   : > { %s221_s6 = scalar_lea.vmem [#allocation4], %s570_s5 }
  0x50   : > { %745 = dma.done.wait (%p1001_p13), %s218_s7, 32  }
  0x51   : > { %747 = vsyncadd (%p1001_p13), %s218_s7, 4294967264  ;;  %vm276_vm0 = vcmask 1043456   ;;  %v270_v0 = vld [vmem:[%s212_s10] sm:$0xff]  ;;  %v321_v15 = vlaneseq  ;;  %v943_v22 = vld [vmem:[%s221_s6] sm:$0x3]  ;;  %vm387_vm4 = vcmask 1040384  }
  0x52   : > { %v274_v1 = vcombine.high %v270_v0, %v270_v0  ;;  %v277_v2 = vsel %vm276_vm0, %v270_v0, -inf  ;;  %vm272_vm3 = vcmp.ne.s32.totalorder %v943_v22, 4294967295  ;;  %p258_p7 = scmp.lt.s32.totalorder %s762_s15, 1  ;;  %vm401_vm5 = vcmask 0  }
  0x53   : > { %v278_v3 = vrot.slane %v277_v2, 4  ;;  %v940_v18 = vshrl.u32 %v321_v15, 7 }
  0x54   : > { %v284_v4 = vsel %vm276_vm0, %v274_v1, -inf  ;;  %s1010_s15 = smov (!%p258_p7, %s762_s15), 1 }
  0x55   : > { %v279_v5 = vmax.f32 %v277_v2, %v278_v3  ;;  %v285_v6 = vrot.slane %v284_v4, 4  ;;  %v325_v21 = vsub.s32 0, %v940_v18  ;;  %v329_v23 = vsub.s32 1, %v940_v18  ;;  %s263_s9 = scalar_lea.vmem %s991_s2, %s1010_s15  ;;  %s269_s18 = scalar_lea.vmem %s992_s3, %s1010_s15 }
  0x57   : > { %v280_v7 = vrot.slane %v279_v5, 2  ;;  %v286_v8 = vmax.f32 %v284_v4, %v285_v6  ;;  %v326_v24 = vrot.slane %v943_v22, %v325_v21  ;;  %v330_v25 = vrot.slane %v943_v22, %v329_v23 }
  0x59   : > { %v281_v9 = vmax.f32 %v279_v5, %v280_v7  ;;  %v287_v10 = vrot.slane %v286_v8, 2  ;;  %vm331_vm1 = vcmp.eq.s32.totalorder %v940_v18, %v326_v24  ;;  %vm332_vm2 = vcmp.eq.s32.totalorder %v940_v18, %v330_v25 }
  0x5a   : > { %v333_v26 = vsel %vm331_vm1, %v270_v0, 0.0  ;;  %v334_v30 = vsel %vm332_vm2, %v274_v1, 0.0 }
  0x5b   : > { %v282_v11 = vrot.slane %v281_v9, 1  ;;  %v288_v12 = vmax.f32 %v286_v8, %v287_v10  ;;  %v335_v32 = vsel %vm276_vm0, %v333_v26, 0.0  ;;  %v342_v36 = vsel %vm276_vm0, %v334_v30, 0.0 }
  0x5c   : > { %v336_v37 = vrot.slane %v335_v32, 4  ;;  %v343_v40 = vrot.slane %v342_v36, 4 }
  0x5d   : > { %v283_v13 = vmax.f32 %v281_v9, %v282_v11  ;;  %v289_v14 = vrot.slane %v288_v12, 1 }
  0x5e   : > { %v337_v43 = vadd.f32 %v336_v37, %v335_v32  ;;  %v344_v46 = vadd.f32 %v343_v40, %v342_v36 }
  0x5f   : > { %v290_v16 = vmax.f32 %v288_v12, %v289_v14 }
  0x60   : > { %v338_v49 = vrot.slane %v337_v43, 2  ;;  %v345_v51 = vrot.slane %v344_v46, 2 }
  0x61   : > { %v293_v17 = vcombine.low %v283_v13, %v290_v16 }
  0x62   : > { %v339_v52 = vadd.f32 %v338_v49, %v337_v43  ;;  %v346_v53 = vadd.f32 %v345_v51, %v344_v46 }
  0x63   : > { %v295_v19 = vsub.f32 %v270_v0, %v293_v17 }
  0x64   : > { %v340_v54 = vrot.slane %v339_v52, 1  ;;  %v347_v55 = vrot.slane %v346_v53, 1 }
  0x65   : > { %v296_v20 = vmul.f32 1.442695, %v295_v19 }
  0x66   : > { %v341_v58 = vadd.f32 %v340_v54, %v339_v52  ;;  %v348_v62 = vadd.f32 %v347_v55, %v346_v53 }
  0x67   : > { %642 = vpow2.f32 %v296_v20 }
  0x71   : > { %v643_v27 = vpop.eup %642 }
  0x72   : > { %v299_v28 = vcombine.high %v643_v27, %v643_v27  ;;  %v301_v29 = vsel %vm276_vm0, %v643_v27, 0.0 }
  0x73   : > { %v302_v31 = vrot.slane %v301_v29, 4 }
  0x74   : > { %v308_v33 = vsel %vm276_vm0, %v299_v28, 0.0 }
  0x75   : > { %v303_v34 = vadd.f32 %v302_v31, %v301_v29  ;;  %v309_v35 = vrot.slane %v308_v33, 4 }
  0x77   : > { %v304_v38 = vrot.slane %v303_v34, 2  ;;  %v310_v39 = vadd.f32 %v309_v35, %v308_v33 }
  0x79   : > { %v305_v41 = vadd.f32 %v304_v38, %v303_v34  ;;  %v311_v42 = vrot.slane %v310_v39, 2 }
  0x7b   : > { %v306_v44 = vrot.slane %v305_v41, 1  ;;  %v312_v45 = vadd.f32 %v311_v42, %v310_v39 }
  0x7d   : > { %v307_v47 = vadd.f32 %v306_v44, %v305_v41  ;;  %v313_v48 = vrot.slane %v312_v45, 1 }
  0x7f   : > { %v314_v50 = vadd.f32 %v313_v48, %v312_v45  ;;  %644 = vlog2.f32 %v307_v47 }
  0x81   : > { %646 = vlog2.f32 %v314_v50 }
  0x89   : > { %v645_v56 = vpop.eup %644 }
  0x8a   : > { %v316_v57 = vmul.f32 0.6931472, %v645_v56 }
  0x8b   : > { %v647_v59 = vpop.eup %646 }
  0x8c   : > { %v318_v60 = vmul.f32 0.6931472, %v647_v59  ;;  %v319_v61 = vadd.f32 %v316_v57, %v283_v13  ;;  %v774_v13 = vmov 0.0  }
  0x8d   : > { %v571_v14 = vsel %vm272_vm3, 1.0, %v774_v13 }
  0x8e   : > { %v320_v63 = vadd.f32 %v318_v60, %v290_v16  ;;  %v349_v0 = vsub.f32 %v341_v58, %v319_v61  ;;  %v378_v25 = vrot.slane %v571_v14, %v325_v21  ;;  %v382_v28 = vrot.slane %v571_v14, %v329_v23 }
  0x90   : > { %v350_v1 = vsub.f32 %v348_v62, %v320_v63  ;;  %v351_v2 = vmul.f32 1.442695, %v349_v0  ;;  %v403_v33 = vsel %vm387_vm4, %v378_v25, 0.0  ;;  %v404_v34 = vsel %vm387_vm4, %v382_v28, 0.0 }
  0x91   : > { %v405_v36 = vadd.f32 %v404_v34, %v403_v33 }
  0x92   : > { %648 = vpow2.f32 %v351_v2  ;;  %v353_v3 = vmul.f32 1.442695, %v350_v1 }
  0x94   : > { %650 = vpow2.f32 %v353_v3 }
  0x9c   : > { %v649_v4 = vpop.eup %648 }
  0x9d   : > { %v355_v5 = vadd.f32 1e-12, %v649_v4  ;;  %v364_v8 = vsub.f32 1.0, %v649_v4 }
  0x9e   : > { %v651_v6 = vpop.eup %650 }
  0x9f   : > { %v356_v7 = vadd.f32 1e-12, %v651_v6  ;;  %652 = vlog2.f32 %v355_v5  ;;  %v365_v9 = vsub.f32 1.0, %v651_v6  ;;  %v366_v10 = vmul.f32 %v364_v8, %v364_v8 }
  0xa1   : > { %654 = vlog2.f32 %v356_v7  ;;  %v367_v11 = vmul.f32 %v365_v9, %v365_v9  ;;  %v370_v16 = vmul.f32 -0.25, %v366_v10 }
  0xa3   : > { %v371_v24 = vmul.f32 -0.25, %v367_v11 }
  0xa9   : > { %v653_v12 = vpop.eup %652 }
  0xaa   : > { %v358_v15 = vmul.f32 0.6931472, %v653_v12 }
  0xab   : > { %v655_v17 = vpop.eup %654 }
  0xac   : > { %v360_v19 = vmul.f32 0.6931472, %v655_v17  ;;  %v362_v20 = vmul.f32 1.442695, %v358_v15 }
  0xae   : > { %v363_v26 = vmul.f32 1.442695, %v360_v19  ;;  %v372_v27 = vmul.f32 %v370_v16, %v362_v20 }
  0xb0   : > { %v373_v22 = vmul.f32 %v371_v24, %v363_v26  ;;  %v385_v29 = vmul.f32 %v378_v25, %v372_v27 }
  0xb2   : > { %v386_v30 = vmul.f32 %v382_v28, %v373_v22  ;;  %v388_v31 = vsel %vm387_vm4, %v385_v29, 0.0 }
  0xb4   : > { %v389_v32 = vsel %vm387_vm4, %v386_v30, 0.0 }
  0xb5   : > { %v390_v35 = vadd.f32 %v389_v32, %v388_v31 }
  0xb7   : > { %391 = vadd.xlane.f32.xlu0 %v390_v35 }
  0xbb   : > { %406 = vadd.xlane.f32.xlu0 %v405_v36 }
 0x144   : > { %v392_v37 = vpop.xlane.xlu0 %391 }
 0x145   : > { %v393_v21 = vrot.slane %v392_v37, 4 }
 0x147   : > { %v394_v38 = vadd.f32 %v393_v21, %v392_v37 }
 0x148   : > { %v407_v39 = vpop.xlane.xlu0 %406 }
 0x149   : > { %v395_v18 = vrot.slane %v394_v38, 2  ;;  %v408_v23 = vrot.slane %v407_v39, 4 }
 0x14b   : > { %v409_v40 = vadd.f32 %v408_v23, %v407_v39  ;;  %v396_v41 = vadd.f32 %v395_v18, %v394_v38 }
 0x14d   : > { %v410_v42 = vrot.slane %v409_v40, 2  ;;  %v397_v43 = vrot.slane %v396_v41, 1 }
 0x14f   : > { %v411_v44 = vadd.f32 %v410_v42, %v409_v40  ;;  %v398_v45 = vadd.f32 %v397_v43, %v396_v41 }
 0x151   : > { %576 = vpush %v398_v45  ;;  %v412_v46 = vrot.slane %v411_v44, 1 }
 0x153   : > { %v413_v47 = vadd.f32 %v412_v46, %v411_v44 }
 0x155   : > { %578 = vpush %v413_v47 }
 0x182   : > { %s577_s11 = spop %576 }
 0x183   : > { %v400_v48 = vstv %s577_s11 }
 0x184   : > { %402 = vst.msk [vmem:[%s263_s9] sm:$0x1] %vm401_vm5, %v400_v48 }
 0x186   : > { %s579_s20 = spop %578 }
 0x187   : > { %v415_v49 = vstv %s579_s20 }
 0x188   : > { %416 = vst.msk [vmem:[%s269_s18] sm:$0x1] %vm401_vm5, %v415_v49 }
 0x189 PF: > { %s20_s17 = sadd.s32 1, %s770_s17   ;;  %s1002_s12 = smov %s754_s13 }
 0x18a   : > { %p17_p9 = scmp.ge.s32.totalorder %s20_s17, 4   ;;  %s1003_s13 = smov %s758_s14 }
 0x18b   : > { %s1004_s14 = smov %s844_s24  ;;  %s1005_s15 = smov %s766_s16 }
 0x18c   : > { %s1006_s16 = smov %s1008_s19  ;;  %19 = sbr.rel (!%p17_p9) target bundleno = 6 (0x6), region = 93 }
 0x193   :  { %458 = vsyncpa [#allocation3], 1 }
 0x194   :  { %460 = vsyncpa [#allocation3 + $0x1], 1 }
 0x195   :  { %461 = vsyncpa [#allocation5], 1 }
 0x196   :  { %463 = vsyncpa [#allocation5 + $0x1], 1 }

</bundles_post_ra>
